<compile_context>
chip_gen: v5e
topology: v5e:2x2
jax: 0.10.0
libtpu: 0.0.40
codegen_flags: <defaults>
</compile_context>

<pallas_src>
import math

import jax
import jax.numpy as jnp
from jax import lax
from jax.experimental import pallas as pl
from jax.experimental.pallas import tpu as pltpu


# ----------------------------------------------------------------------------
# Kernel
# ----------------------------------------------------------------------------
def _make_residual_block_kernel(H, W, C0, C1, B):
    HW = H * W
    HWP = HW + 2 * W + 2   # flat-padded image: one zero row + one zero column each side
    OFF = W + 1            # flat-pad offset of the image interior

    def kernel(x_ref, w1_ref, w2_ref, b1_ref, b2_ref, mask_ref,
               o_ref, ypf_ref, im_ref):
        # x_ref   : (B, C1, HW)  f32   input / residual (channels-first, flat spatial)
        # w1_ref  : (C0, C1)     bf16  1x1 conv weight, BN1 scale pre-folded
        # w2_ref  : (C1, 9*C0)   bf16  3x3 conv weight (im2col layout), BN2 scale folded
        # b*_ref  : (C, 1)       f32   folded BatchNorm bias
        # mask_ref: (2, HW)      bf16  row0: (w >= 1) valid, row1: (w <= W-2) valid
        # o_ref   : (B, C1, HW)  f32
        # ypf_ref : (C0, B*HWP)  bf16  per-image flat zero-padded intermediate (scratch)
        # im_ref  : (9*C0, B*HW) bf16  im2col matrix (scratch)

        # Zero the pad scratch once: interiors are fully overwritten every grid
        # step and the pad columns are never written, so they stay zero.
        @pl.when(pl.program_id(0) == 0)
        def _():
            ypf_ref[...] = jnp.zeros_like(ypf_ref)

        mask_l = mask_ref[0:1, :]   # kills the (w-1) row-wrap at w == 0
        mask_r = mask_ref[1:2, :]   # kills the (w+1) row-wrap at w == W-1
        b1 = b1_ref[...]
        b2 = b2_ref[...]

        # ---- stage 1 (per image): 1x1 conv (bf16 MXU, f32 acc, BN1 folded)
        #      + bias + LeakyReLU(0.1), written into that image's pad slot.
        for n in range(B):
            xn = x_ref[n]                                          # (C1, HW) f32
            y1 = jnp.dot(w1_ref[...], xn.astype(jnp.bfloat16),
                         preferred_element_type=jnp.float32)       # (C0, HW)
            y1 = y1 + b1
            y1 = jnp.where(y1 > 0, y1, 0.1 * y1)
            base = n * HWP + OFF
            ypf_ref[:, base:base + HW] = y1.astype(jnp.bfloat16)

        # ---- im2col: 9 shifted flat views per image -> (9*C0, B*HW)
        for n in range(B):
            for dh in range(3):
                for dw in range(3):
                    tap = dh * 3 + dw
                    start = n * HWP + dh * W + dw                  # static offset
                    patch = ypf_ref[:, start:start + HW]           # (C0, HW) bf16
                    if dw == 0:
                        patch = patch * mask_l
                    elif dw == 2:
                        patch = patch * mask_r
                    im_ref[tap * C0:(tap + 1) * C0,
                           n * HW:(n + 1) * HW] = patch

        # ---- stage 2: single big-K matmul over the whole chunk (BN2 folded)
        #      + bias + LeakyReLU + residual, per-image writeback.
        y2 = jnp.dot(w2_ref[...], im_ref[...],
                     preferred_element_type=jnp.float32)           # (C1, B*HW)
        y2 = y2 + b2
        y2 = jnp.where(y2 > 0, y2, 0.1 * y2)
        for n in range(B):
            o_ref[n] = (y2[:, n * HW:(n + 1) * HW]
                        + x_ref[n]).astype(o_ref.dtype)

    return kernel


# ----------------------------------------------------------------------------
# Wrapper
# ----------------------------------------------------------------------------
def _pick_batch_tile(N, C0, C1, HW, HWP, budget_bytes=20 * 2**20):
    """Largest divisor of N whose per-step blocks + scratch fit the budget."""
    best = 1
    for b in range(1, N + 1):
        if N % b:
            continue
        est = (4 * b * C1 * HW * 4          # double-buffered x + out blocks
               + b * C0 * HWP * 2           # flat-pad scratch
               + 9 * C0 * b * HW * 2)       # im2col scratch
        if est <= budget_bytes:
            best = b
    return best


def residual_block_forward(x_nchw, params):
    """x_nchw: (N, C1, H, W) float32 -> (N, C1, H, W) float32 (NCHW semantics)."""
    N, C1, H, W = x_nchw.shape
    w1f, w2f = params["w1f"], params["w2f"]
    C0 = w1f.shape[0]
    HW = H * W
    HWP = HW + 2 * W + 2

    B = _pick_batch_tile(N, C0, C1, HW, HWP)

    # NCHW -> (N, C1, H*W): contiguous reshape, no transpose / data movement.
    x2d = x_nchw.reshape(N, C1, HW)

    # 0/1 lane masks for the horizontally shifted taps (built once outside).
    w_idx = jnp.arange(HW, dtype=jnp.int32) % W
    edge_mask = jnp.stack([w_idx >= 1, w_idx <= W - 2]).astype(jnp.bfloat16)

    kernel = _make_residual_block_kernel(H, W, C0, C1, B)

    flops = 2 * N * HW * (C1 * C0 + 9 * C0 * C1)
    bytes_accessed = (2 * N * C1 * HW * 4            # x in + out (f32)
                      + (C0 * C1 + 9 * C0 * C1) * 2  # bf16 folded weights
                      + (C0 + C1) * 4                # folded BN biases
                      + 2 * HW * 2)                  # edge masks

    # Shape-aware VMEM budget (generous headroom, capped under v7x's 64 MiB/TC).
    vmem_est = (4 * B * C1 * HW * 4                  # double-buffered x + out blocks
                + 2 * (C0 * C1 + 9 * C0 * C1) * 2    # weights (double-buffered)
                + B * C0 * HWP * 2                   # flat-pad scratch
                + 9 * C0 * B * HW * 2                # im2col scratch
                + 256 * 1024)                        # small operands + slack
    vmem_limit = int(min(56 * 2**20, 16 * 2**20 + 2 * vmem_est))

    out2d = pl.pallas_call(
        kernel,
        out_shape=jax.ShapeDtypeStruct((N, C1, HW), x_nchw.dtype),
        grid_spec=pltpu.PrefetchScalarGridSpec(
            num_scalar_prefetch=0,
            grid=(N // B,),
            in_specs=[
                pl.BlockSpec((B, C1, HW), lambda t: (t, 0, 0)),   # x
                pl.BlockSpec((C0, C1), lambda t: (0, 0)),         # w1 (BN1 folded)
                pl.BlockSpec((C1, 9 * C0), lambda t: (0, 0)),     # w2 (BN2 folded)
                pl.BlockSpec((C0, 1), lambda t: (0, 0)),          # b1
                pl.BlockSpec((C1, 1), lambda t: (0, 0)),          # b2
                pl.BlockSpec((2, HW), lambda t: (0, 0)),          # edge masks
            ],
            out_specs=pl.BlockSpec((B, C1, HW), lambda t: (t, 0, 0)),
            scratch_shapes=[
                pltpu.VMEM((C0, B * HWP), jnp.bfloat16),       # flat-padded y1
                pltpu.VMEM((9 * C0, B * HW), jnp.bfloat16),    # im2col matrix
            ],
        ),
        compiler_params=pltpu.CompilerParams(
            dimension_semantics=("parallel",),
            vmem_limit_bytes=vmem_limit,
        ),
        cost_estimate=pl.CostEstimate(
            flops=flops, transcendentals=0, bytes_accessed=bytes_accessed),
    )(x2d, w1f, w2f, params["b1"], params["b2"], edge_mask)

    return out2d.reshape(N, C1, H, W)


# ----------------------------------------------------------------------------
# Deterministic parameter construction (matches PyTorch module shapes)
# ----------------------------------------------------------------------------
def init_params(key, c0, c1, eps=1e-5):
    ks = jax.random.split(key, 10)
    # Conv weights (PyTorch layout: OIHW), bias=False.
    w1 = jax.random.normal(ks[0], (c0, c1, 1, 1), jnp.float32) / math.sqrt(c1)
    w2 = jax.random.normal(ks[1], (c1, c0, 3, 3), jnp.float32) / math.sqrt(9 * c0)
    # BatchNorm params + running stats (deterministic, non-trivial).
    g1 = 1.0 + 0.1 * jax.random.normal(ks[2], (c0,), jnp.float32)
    be1 = 0.1 * jax.random.normal(ks[3], (c0,), jnp.float32)
    rm1 = 0.1 * jax.random.normal(ks[4], (c0,), jnp.float32)
    rv1 = 0.5 + jax.random.uniform(ks[5], (c0,), jnp.float32)
    g2 = 1.0 + 0.1 * jax.random.normal(ks[6], (c1,), jnp.float32)
    be2 = 0.1 * jax.random.normal(ks[7], (c1,), jnp.float32)
    rm2 = 0.1 * jax.random.normal(ks[8], (c1,), jnp.float32)
    rv2 = 0.5 + jax.random.uniform(ks[9], (c1,), jnp.float32)
    # Fold BN into per-channel scale / bias (inference mode).
    s1 = g1 / jnp.sqrt(rv1 + eps)
    b1 = be1 - rm1 * s1
    s2 = g2 / jnp.sqrt(rv2 + eps)
    b2 = be2 - rm2 * s2

    # Kernel-side folded weights (BN scale folded into the conv weight in f32,
    # then cast to bf16 for the MXU):
    #   w1f[c0, c1]                = s1[c0] * w1[c0, c1, 0, 0]
    #   w2f[c1, (dh*3+dw)*C0 + c0] = s2[c1] * w2[c1, c0, dh, dw]
    w1f = (s1[:, None] * w1.reshape(c0, c1)).astype(jnp.bfloat16)
    w2_im = jnp.transpose(w2, (0, 2, 3, 1)).reshape(c1, 9 * c0)
    w2f = (s2[:, None] * w2_im).astype(jnp.bfloat16)

    # f32 reference weights derived from the bf16 folded ones (w_ref = bf16(s*w)/s)
    # so kernel vs reference differs only through activation rounding, not
    # weight quantization.
    w1_ref = (w1f.astype(jnp.float32) / s1[:, None]).reshape(c0, c1, 1, 1)
    w2_ref = jnp.transpose(
        (w2f.astype(jnp.float32) / s2[:, None]).reshape(c1, 3, 3, c0),
        (0, 3, 1, 2))

    return {
        "w1": w1_ref, "w2": w2_ref,          # reference (OIHW, f32)
        "w1f": w1f, "w2f": w2f,              # kernel (folded, bf16)
        "s1": s1.reshape(c0, 1), "b1": b1.reshape(c0, 1),
        "s2": s2.reshape(c1, 1), "b2": b2.reshape(c1, 1),
    }


def reference_forward(x_nchw, params):
    """Pure-JAX f32 reference (NCHW) mirroring the PyTorch forward."""
    dn = ("NCHW", "OIHW", "NCHW")
    s1 = params["s1"].reshape(1, -1, 1, 1)
    b1 = params["b1"].reshape(1, -1, 1, 1)
    s2 = params["s2"].reshape(1, -1, 1, 1)
    b2 = params["b2"].reshape(1, -1, 1, 1)
    y = lax.conv_general_dilated(x_nchw, params["w1"], (1, 1), "VALID",
                                 dimension_numbers=dn)
    y = y * s1 + b1
    y = jnp.where(y > 0, y, 0.1 * y)
    y = lax.conv_general_dilated(y, params["w2"], (1, 1), ((1, 1), (1, 1)),
                                 dimension_numbers=dn)
    y = y * s2 + b2
    y = jnp.where(y > 0, y, 0.1 * y)
    return y + x_nchw


if __name__ == "__main__":
    # ResidualBlock(CiCo=[4, 8]): input has C1=8 channels; bottleneck C0=4.
    N, C0, C1, H, W = 2, 4, 8, 16, 16
    key = jax.random.PRNGKey(0)
    k_x, k_p = jax.random.split(key)
    x = jax.random.normal(k_x, (N, C1, H, W), jnp.float32)
    params = init_params(k_p, C0, C1)

    fwd = jax.jit(residual_block_forward)
    out = jax.block_until_ready(fwd(x, params))

    ref = reference_forward(x, params)
    assert out.shape == (N, C1, H, W)
    err = float(jnp.max(jnp.abs(out - ref)))
    # bf16 activations on the MXU (f32 accumulation) -> loosened tolerance vs
    # the pure-f32 reference (intentional precision loss).
    assert jnp.allclose(out, ref, rtol=5e-2, atol=5e-2), f"max abs err {err}"
    print("KERNEL_OK")
</pallas_src>

<mosaic_0001>
module attributes {stable_mosaic.version = 11 : i64} {
  func.func @kernel(%arg0: i32, %arg1: memref<2x8x256xf32, #tpu.memory_space<vmem>>, %arg2: memref<4x8xbf16, #tpu.memory_space<vmem>>, %arg3: memref<8x36xbf16, #tpu.memory_space<vmem>>, %arg4: memref<4x1xf32, #tpu.memory_space<vmem>>, %arg5: memref<8x1xf32, #tpu.memory_space<vmem>>, %arg6: memref<2x256xbf16, #tpu.memory_space<vmem>>, %arg7: memref<2x8x256xf32, #tpu.memory_space<vmem>>, %arg8: memref<4x580xbf16, #tpu.memory_space<vmem>>, %arg9: memref<36x512xbf16, #tpu.memory_space<vmem>>) attributes {dimension_semantics = [#tpu.dimension_semantics<parallel>], iteration_bounds = array<i64: 1>, scalar_prefetch = 0 : i64, scratch_operands = 2 : i64, tpu.core_type = #tpu.core_type<tc>, window_params = [{transform_indices = @transform_0, window_bounds = array<i64: 2, 8, 256>}, {pipeline_mode = #tpu.pipeline_mode<synchronous>, transform_indices = @transform_1, window_bounds = array<i64: 4, 8>}, {pipeline_mode = #tpu.pipeline_mode<synchronous>, transform_indices = @transform_2, window_bounds = array<i64: 8, 36>}, {pipeline_mode = #tpu.pipeline_mode<synchronous>, transform_indices = @transform_3, window_bounds = array<i64: 4, 1>}, {pipeline_mode = #tpu.pipeline_mode<synchronous>, transform_indices = @transform_4, window_bounds = array<i64: 8, 1>}, {pipeline_mode = #tpu.pipeline_mode<synchronous>, transform_indices = @transform_5, window_bounds = array<i64: 2, 256>}, {transform_indices = @transform_6, window_bounds = array<i64: 2, 8, 256>}]} {
    %c0_i32 = arith.constant 0 : i32
    %0 = arith.cmpi eq, %arg0, %c0_i32 : i32
    %1 = arith.extui %0 : i1 to i32
    %c0_i32_0 = arith.constant 0 : i32
    %2 = arith.cmpi ne, %1, %c0_i32_0 : i32
    scf.if %2 {
      %cst_94 = arith.constant 0.000000e+00 : bf16
      %119 = vector.broadcast %cst_94 : bf16 to vector<4x580xbf16>
      %c0_95 = arith.constant 0 : index
      %c0_96 = arith.constant 0 : index
      %120 = vector.load %arg8[%c0_95, %c0_96] : memref<4x580xbf16, #tpu.memory_space<vmem>>, vector<4x580xbf16>
      tpu.vector_store %arg8[%c0_95, %c0_96], %119 {strides = array<i32>} : memref<4x580xbf16, #tpu.memory_space<vmem>>, vector<4x580xbf16>,
    } else {
    }
    %c0 = arith.constant 0 : index
    %c0_1 = arith.constant 0 : index
    %3 = vector.load %arg6[%c0, %c0_1] : memref<2x256xbf16, #tpu.memory_space<vmem>>, vector<1x256xbf16>
    %c1 = arith.constant 1 : index
    %c0_2 = arith.constant 0 : index
    %4 = vector.load %arg6[%c1, %c0_2] : memref<2x256xbf16, #tpu.memory_space<vmem>>, vector<1x256xbf16>
    %c0_3 = arith.constant 0 : index
    %c0_4 = arith.constant 0 : index
    %5 = vector.load %arg4[%c0_3, %c0_4] : memref<4x1xf32, #tpu.memory_space<vmem>>, vector<4x1xf32>
    %c0_5 = arith.constant 0 : index
    %c0_6 = arith.constant 0 : index
    %6 = vector.load %arg5[%c0_5, %c0_6] : memref<8x1xf32, #tpu.memory_space<vmem>>, vector<8x1xf32>
    %c0_7 = arith.constant 0 : index
    %c0_8 = arith.constant 0 : index
    %c0_9 = arith.constant 0 : index
    %7 = vector.load %arg1[%c0_7, %c0_8, %c0_9] : memref<2x8x256xf32, #tpu.memory_space<vmem>>, vector<1x8x256xf32>
    %8 = vector.shape_cast %7 : vector<1x8x256xf32> to vector<8x256xf32>
    %c0_10 = arith.constant 0 : index
    %c0_11 = arith.constant 0 : index
    %9 = vector.load %arg2[%c0_10, %c0_11] : memref<4x8xbf16, #tpu.memory_space<vmem>>, vector<4x8xbf16>
    %10 = arith.truncf %8 : vector<8x256xf32> to vector<8x256xbf16>
    %cst = arith.constant dense<0.000000e+00> : vector<4x256xf32>
    %11 = tpu.matmul %9, %10, %cst {dimension_numbers = #tpu.dot_dimension_numbers<[1], [0], [0], [1], [0, 0, 1, 1], [], []>} : vector<4x8xbf16>, vector<8x256xbf16>, vector<4x256xf32> -> vector<4x256xf32>
    %12 = vector.broadcast %5 : vector<4x1xf32> to vector<4x256xf32>
    %13 = arith.addf %11, %12 : vector<4x256xf32>
    %cst_12 = arith.constant 0.000000e+00 : f32
    %14 = vector.broadcast %cst_12 : f32 to vector<4x256xf32>
    %15 = arith.cmpf ogt, %13, %14 : vector<4x256xf32>
    %cst_13 = arith.constant 1.000000e-01 : f32
    %16 = vector.broadcast %cst_13 : f32 to vector<4x256xf32>
    %17 = arith.mulf %16, %13 : vector<4x256xf32>
    %18 = arith.select %15, %13, %17 : vector<4x256xi1>, vector<4x256xf32>
    %19 = arith.truncf %18 : vector<4x256xf32> to vector<4x256xbf16>
    %c0_14 = arith.constant 0 : index
    %c17 = arith.constant 17 : index
    %20 = vector.load %arg8[%c0_14, %c17] : memref<4x580xbf16, #tpu.memory_space<vmem>>, vector<4x256xbf16>
    tpu.vector_store %arg8[%c0_14, %c17], %19 {strides = array<i32>} : memref<4x580xbf16, #tpu.memory_space<vmem>>, vector<4x256xbf16>,
    %c1_15 = arith.constant 1 : index
    %c0_16 = arith.constant 0 : index
    %c0_17 = arith.constant 0 : index
    %21 = vector.load %arg1[%c1_15, %c0_16, %c0_17] : memref<2x8x256xf32, #tpu.memory_space<vmem>>, vector<1x8x256xf32>
    %22 = vector.shape_cast %21 : vector<1x8x256xf32> to vector<8x256xf32>
    %c0_18 = arith.constant 0 : index
    %c0_19 = arith.constant 0 : index
    %23 = vector.load %arg2[%c0_18, %c0_19] : memref<4x8xbf16, #tpu.memory_space<vmem>>, vector<4x8xbf16>
    %24 = arith.truncf %22 : vector<8x256xf32> to vector<8x256xbf16>
    %cst_20 = arith.constant dense<0.000000e+00> : vector<4x256xf32>
    %25 = tpu.matmul %23, %24, %cst_20 {dimension_numbers = #tpu.dot_dimension_numbers<[1], [0], [0], [1], [0, 0, 1, 1], [], []>} : vector<4x8xbf16>, vector<8x256xbf16>, vector<4x256xf32> -> vector<4x256xf32>
    %26 = vector.broadcast %5 : vector<4x1xf32> to vector<4x256xf32>
    %27 = arith.addf %25, %26 : vector<4x256xf32>
    %cst_21 = arith.constant 0.000000e+00 : f32
    %28 = vector.broadcast %cst_21 : f32 to vector<4x256xf32>
    %29 = arith.cmpf ogt, %27, %28 : vector<4x256xf32>
    %cst_22 = arith.constant 1.000000e-01 : f32
    %30 = vector.broadcast %cst_22 : f32 to vector<4x256xf32>
    %31 = arith.mulf %30, %27 : vector<4x256xf32>
    %32 = arith.select %29, %27, %31 : vector<4x256xi1>, vector<4x256xf32>
    %33 = arith.truncf %32 : vector<4x256xf32> to vector<4x256xbf16>
    %c0_23 = arith.constant 0 : index
    %c307 = arith.constant 307 : index
    %34 = vector.load %arg8[%c0_23, %c307] : memref<4x580xbf16, #tpu.memory_space<vmem>>, vector<4x256xbf16>
    tpu.vector_store %arg8[%c0_23, %c307], %33 {strides = array<i32>} : memref<4x580xbf16, #tpu.memory_space<vmem>>, vector<4x256xbf16>,
    %c0_24 = arith.constant 0 : index
    %c0_25 = arith.constant 0 : index
    %35 = vector.load %arg8[%c0_24, %c0_25] : memref<4x580xbf16, #tpu.memory_space<vmem>>, vector<4x256xbf16>
    %36 = vector.broadcast %3 : vector<1x256xbf16> to vector<4x256xbf16>
    %37 = arith.mulf %35, %36 : vector<4x256xbf16>
    %c0_26 = arith.constant 0 : index
    %c0_27 = arith.constant 0 : index
    %38 = vector.load %arg9[%c0_26, %c0_27] : memref<36x512xbf16, #tpu.memory_space<vmem>>, vector<4x256xbf16>
    tpu.vector_store %arg9[%c0_26, %c0_27], %37 {strides = array<i32>} : memref<36x512xbf16, #tpu.memory_space<vmem>>, vector<4x256xbf16>,
    %c0_28 = arith.constant 0 : index
    %c1_29 = arith.constant 1 : index
    %39 = vector.load %arg8[%c0_28, %c1_29] : memref<4x580xbf16, #tpu.memory_space<vmem>>, vector<4x256xbf16>
    %c4 = arith.constant 4 : index
    %c0_30 = arith.constant 0 : index
    %40 = vector.load %arg9[%c4, %c0_30] : memref<36x512xbf16, #tpu.memory_space<vmem>>, vector<4x256xbf16>
    tpu.vector_store %arg9[%c4, %c0_30], %39 {strides = array<i32>} : memref<36x512xbf16, #tpu.memory_space<vmem>>, vector<4x256xbf16>,
    %c0_31 = arith.constant 0 : index
    %c2 = arith.constant 2 : index
    %41 = vector.load %arg8[%c0_31, %c2] : memref<4x580xbf16, #tpu.memory_space<vmem>>, vector<4x256xbf16>
    %42 = vector.broadcast %4 : vector<1x256xbf16> to vector<4x256xbf16>
    %43 = arith.mulf %41, %42 : vector<4x256xbf16>
    %c8 = arith.constant 8 : index
    %c0_32 = arith.constant 0 : index
    %44 = vector.load %arg9[%c8, %c0_32] : memref<36x512xbf16, #tpu.memory_space<vmem>>, vector<4x256xbf16>
    tpu.vector_store %arg9[%c8, %c0_32], %43 {strides = array<i32>} : memref<36x512xbf16, #tpu.memory_space<vmem>>, vector<4x256xbf16>,
    %c0_33 = arith.constant 0 : index
    %c16 = arith.constant 16 : index
    %45 = vector.load %arg8[%c0_33, %c16] : memref<4x580xbf16, #tpu.memory_space<vmem>>, vector<4x256xbf16>
    %46 = vector.broadcast %3 : vector<1x256xbf16> to vector<4x256xbf16>
    %47 = arith.mulf %45, %46 : vector<4x256xbf16>
    %c12 = arith.constant 12 : index
    %c0_34 = arith.constant 0 : index
    %48 = vector.load %arg9[%c12, %c0_34] : memref<36x512xbf16, #tpu.memory_space<vmem>>, vector<4x256xbf16>
    tpu.vector_store %arg9[%c12, %c0_34], %47 {strides = array<i32>} : memref<36x512xbf16, #tpu.memory_space<vmem>>, vector<4x256xbf16>,
    %c0_35 = arith.constant 0 : index
    %c17_36 = arith.constant 17 : index
    %49 = vector.load %arg8[%c0_35, %c17_36] : memref<4x580xbf16, #tpu.memory_space<vmem>>, vector<4x256xbf16>
    %c16_37 = arith.constant 16 : index
    %c0_38 = arith.constant 0 : index
    %50 = vector.load %arg9[%c16_37, %c0_38] : memref<36x512xbf16, #tpu.memory_space<vmem>>, vector<4x256xbf16>
    tpu.vector_store %arg9[%c16_37, %c0_38], %49 {strides = array<i32>} : memref<36x512xbf16, #tpu.memory_space<vmem>>, vector<4x256xbf16>,
    %c0_39 = arith.constant 0 : index
    %c18 = arith.constant 18 : index
    %51 = vector.load %arg8[%c0_39, %c18] : memref<4x580xbf16, #tpu.memory_space<vmem>>, vector<4x256xbf16>
    %52 = vector.broadcast %4 : vector<1x256xbf16> to vector<4x256xbf16>
    %53 = arith.mulf %51, %52 : vector<4x256xbf16>
    %c20 = arith.constant 20 : index
    %c0_40 = arith.constant 0 : index
    %54 = vector.load %arg9[%c20, %c0_40] : memref<36x512xbf16, #tpu.memory_space<vmem>>, vector<4x256xbf16>
    tpu.vector_store %arg9[%c20, %c0_40], %53 {strides = array<i32>} : memref<36x512xbf16, #tpu.memory_space<vmem>>, vector<4x256xbf16>,
    %c0_41 = arith.constant 0 : index
    %c32 = arith.constant 32 : index
    %55 = vector.load %arg8[%c0_41, %c32] : memref<4x580xbf16, #tpu.memory_space<vmem>>, vector<4x256xbf16>
    %56 = vector.broadcast %3 : vector<1x256xbf16> to vector<4x256xbf16>
    %57 = arith.mulf %55, %56 : vector<4x256xbf16>
    %c24 = arith.constant 24 : index
    %c0_42 = arith.constant 0 : index
    %58 = vector.load %arg9[%c24, %c0_42] : memref<36x512xbf16, #tpu.memory_space<vmem>>, vector<4x256xbf16>
    tpu.vector_store %arg9[%c24, %c0_42], %57 {strides = array<i32>} : memref<36x512xbf16, #tpu.memory_space<vmem>>, vector<4x256xbf16>,
    %c0_43 = arith.constant 0 : index
    %c33 = arith.constant 33 : index
    %59 = vector.load %arg8[%c0_43, %c33] : memref<4x580xbf16, #tpu.memory_space<vmem>>, vector<4x256xbf16>
    %c28 = arith.constant 28 : index
    %c0_44 = arith.constant 0 : index
    %60 = vector.load %arg9[%c28, %c0_44] : memref<36x512xbf16, #tpu.memory_space<vmem>>, vector<4x256xbf16>
    tpu.vector_store %arg9[%c28, %c0_44], %59 {strides = array<i32>} : memref<36x512xbf16, #tpu.memory_space<vmem>>, vector<4x256xbf16>,
    %c0_45 = arith.constant 0 : index
    %c34 = arith.constant 34 : index
    %61 = vector.load %arg8[%c0_45, %c34] : memref<4x580xbf16, #tpu.memory_space<vmem>>, vector<4x256xbf16>
    %62 = vector.broadcast %4 : vector<1x256xbf16> to vector<4x256xbf16>
    %63 = arith.mulf %61, %62 : vector<4x256xbf16>
    %c32_46 = arith.constant 32 : index
    %c0_47 = arith.constant 0 : index
    %64 = vector.load %arg9[%c32_46, %c0_47] : memref<36x512xbf16, #tpu.memory_space<vmem>>, vector<4x256xbf16>
    tpu.vector_store %arg9[%c32_46, %c0_47], %63 {strides = array<i32>} : memref<36x512xbf16, #tpu.memory_space<vmem>>, vector<4x256xbf16>,
    %c0_48 = arith.constant 0 : index
    %c290 = arith.constant 290 : index
    %65 = vector.load %arg8[%c0_48, %c290] : memref<4x580xbf16, #tpu.memory_space<vmem>>, vector<4x256xbf16>
    %66 = vector.broadcast %3 : vector<1x256xbf16> to vector<4x256xbf16>
    %67 = arith.mulf %65, %66 : vector<4x256xbf16>
    %c0_49 = arith.constant 0 : index
    %c256 = arith.constant 256 : index
    %68 = vector.load %arg9[%c0_49, %c256] : memref<36x512xbf16, #tpu.memory_space<vmem>>, vector<4x256xbf16>
    tpu.vector_store %arg9[%c0_49, %c256], %67 {strides = array<i32>} : memref<36x512xbf16, #tpu.memory_space<vmem>>, vector<4x256xbf16>,
    %c0_50 = arith.constant 0 : index
    %c291 = arith.constant 291 : index
    %69 = vector.load %arg8[%c0_50, %c291] : memref<4x580xbf16, #tpu.memory_space<vmem>>, vector<4x256xbf16>
    %c4_51 = arith.constant 4 : index
    %c256_52 = arith.constant 256 : index
    %70 = vector.load %arg9[%c4_51, %c256_52] : memref<36x512xbf16, #tpu.memory_space<vmem>>, vector<4x256xbf16>
    tpu.vector_store %arg9[%c4_51, %c256_52], %69 {strides = array<i32>} : memref<36x512xbf16, #tpu.memory_space<vmem>>, vector<4x256xbf16>,
    %c0_53 = arith.constant 0 : index
    %c292 = arith.constant 292 : index
    %71 = vector.load %arg8[%c0_53, %c292] : memref<4x580xbf16, #tpu.memory_space<vmem>>, vector<4x256xbf16>
    %72 = vector.broadcast %4 : vector<1x256xbf16> to vector<4x256xbf16>
    %73 = arith.mulf %71, %72 : vector<4x256xbf16>
    %c8_54 = arith.constant 8 : index
    %c256_55 = arith.constant 256 : index
    %74 = vector.load %arg9[%c8_54, %c256_55] : memref<36x512xbf16, #tpu.memory_space<vmem>>, vector<4x256xbf16>
    tpu.vector_store %arg9[%c8_54, %c256_55], %73 {strides = array<i32>} : memref<36x512xbf16, #tpu.memory_space<vmem>>, vector<4x256xbf16>,
    %c0_56 = arith.constant 0 : index
    %c306 = arith.constant 306 : index
    %75 = vector.load %arg8[%c0_56, %c306] : memref<4x580xbf16, #tpu.memory_space<vmem>>, vector<4x256xbf16>
    %76 = vector.broadcast %3 : vector<1x256xbf16> to vector<4x256xbf16>
    %77 = arith.mulf %75, %76 : vector<4x256xbf16>
    %c12_57 = arith.constant 12 : index
    %c256_58 = arith.constant 256 : index
    %78 = vector.load %arg9[%c12_57, %c256_58] : memref<36x512xbf16, #tpu.memory_space<vmem>>, vector<4x256xbf16>
    tpu.vector_store %arg9[%c12_57, %c256_58], %77 {strides = array<i32>} : memref<36x512xbf16, #tpu.memory_space<vmem>>, vector<4x256xbf16>,
    %c0_59 = arith.constant 0 : index
    %c307_60 = arith.constant 307 : index
    %79 = vector.load %arg8[%c0_59, %c307_60] : memref<4x580xbf16, #tpu.memory_space<vmem>>, vector<4x256xbf16>
    %c16_61 = arith.constant 16 : index
    %c256_62 = arith.constant 256 : index
    %80 = vector.load %arg9[%c16_61, %c256_62] : memref<36x512xbf16, #tpu.memory_space<vmem>>, vector<4x256xbf16>
    tpu.vector_store %arg9[%c16_61, %c256_62], %79 {strides = array<i32>} : memref<36x512xbf16, #tpu.memory_space<vmem>>, vector<4x256xbf16>,
    %c0_63 = arith.constant 0 : index
    %c308 = arith.constant 308 : index
    %81 = vector.load %arg8[%c0_63, %c308] : memref<4x580xbf16, #tpu.memory_space<vmem>>, vector<4x256xbf16>
    %82 = vector.broadcast %4 : vector<1x256xbf16> to vector<4x256xbf16>
    %83 = arith.mulf %81, %82 : vector<4x256xbf16>
    %c20_64 = arith.constant 20 : index
    %c256_65 = arith.constant 256 : index
    %84 = vector.load %arg9[%c20_64, %c256_65] : memref<36x512xbf16, #tpu.memory_space<vmem>>, vector<4x256xbf16>
    tpu.vector_store %arg9[%c20_64, %c256_65], %83 {strides = array<i32>} : memref<36x512xbf16, #tpu.memory_space<vmem>>, vector<4x256xbf16>,
    %c0_66 = arith.constant 0 : index
    %c322 = arith.constant 322 : index
    %85 = vector.load %arg8[%c0_66, %c322] : memref<4x580xbf16, #tpu.memory_space<vmem>>, vector<4x256xbf16>
    %86 = vector.broadcast %3 : vector<1x256xbf16> to vector<4x256xbf16>
    %87 = arith.mulf %85, %86 : vector<4x256xbf16>
    %c24_67 = arith.constant 24 : index
    %c256_68 = arith.constant 256 : index
    %88 = vector.load %arg9[%c24_67, %c256_68] : memref<36x512xbf16, #tpu.memory_space<vmem>>, vector<4x256xbf16>
    tpu.vector_store %arg9[%c24_67, %c256_68], %87 {strides = array<i32>} : memref<36x512xbf16, #tpu.memory_space<vmem>>, vector<4x256xbf16>,
    %c0_69 = arith.constant 0 : index
    %c323 = arith.constant 323 : index
    %89 = vector.load %arg8[%c0_69, %c323] : memref<4x580xbf16, #tpu.memory_space<vmem>>, vector<4x256xbf16>
    %c28_70 = arith.constant 28 : index
    %c256_71 = arith.constant 256 : index
    %90 = vector.load %arg9[%c28_70, %c256_71] : memref<36x512xbf16, #tpu.memory_space<vmem>>, vector<4x256xbf16>
    tpu.vector_store %arg9[%c28_70, %c256_71], %89 {strides = array<i32>} : memref<36x512xbf16, #tpu.memory_space<vmem>>, vector<4x256xbf16>,
    %c0_72 = arith.constant 0 : index
    %c324 = arith.constant 324 : index
    %91 = vector.load %arg8[%c0_72, %c324] : memref<4x580xbf16, #tpu.memory_space<vmem>>, vector<4x256xbf16>
    %92 = vector.broadcast %4 : vector<1x256xbf16> to vector<4x256xbf16>
    %93 = arith.mulf %91, %92 : vector<4x256xbf16>
    %c32_73 = arith.constant 32 : index
    %c256_74 = arith.constant 256 : index
    %94 = vector.load %arg9[%c32_73, %c256_74] : memref<36x512xbf16, #tpu.memory_space<vmem>>, vector<4x256xbf16>
    tpu.vector_store %arg9[%c32_73, %c256_74], %93 {strides = array<i32>} : memref<36x512xbf16, #tpu.memory_space<vmem>>, vector<4x256xbf16>,
    %c0_75 = arith.constant 0 : index
    %c0_76 = arith.constant 0 : index
    %95 = vector.load %arg3[%c0_75, %c0_76] : memref<8x36xbf16, #tpu.memory_space<vmem>>, vector<8x36xbf16>
    %c0_77 = arith.constant 0 : index
    %c0_78 = arith.constant 0 : index
    %96 = vector.load %arg9[%c0_77, %c0_78] : memref<36x512xbf16, #tpu.memory_space<vmem>>, vector<36x512xbf16>
    %cst_79 = arith.constant dense<0.000000e+00> : vector<8x512xf32>
    %97 = tpu.matmul %95, %96, %cst_79 {dimension_numbers = #tpu.dot_dimension_numbers<[1], [0], [0], [1], [0, 0, 1, 1], [], []>} : vector<8x36xbf16>, vector<36x512xbf16>, vector<8x512xf32> -> vector<8x512xf32>
    %98 = vector.broadcast %6 : vector<8x1xf32> to vector<8x512xf32>
    %99 = arith.addf %97, %98 : vector<8x512xf32>
    %cst_80 = arith.constant 0.000000e+00 : f32
    %100 = vector.broadcast %cst_80 : f32 to vector<8x512xf32>
    %101 = arith.cmpf ogt, %99, %100 : vector<8x512xf32>
    %cst_81 = arith.constant 1.000000e-01 : f32
    %102 = vector.broadcast %cst_81 : f32 to vector<8x512xf32>
    %103 = arith.mulf %102, %99 : vector<8x512xf32>
    %104 = arith.select %101, %99, %103 : vector<8x512xi1>, vector<8x512xf32>
    %105 = vector.extract_strided_slice %104 {offsets = [0, 0], sizes = [8, 256], strides = [1, 1]} : vector<8x512xf32> to vector<8x256xf32>
    %c0_82 = arith.constant 0 : index
    %c0_83 = arith.constant 0 : index
    %c0_84 = arith.constant 0 : index
    %106 = vector.load %arg1[%c0_82, %c0_83, %c0_84] : memref<2x8x256xf32, #tpu.memory_space<vmem>>, vector<1x8x256xf32>
    %107 = vector.shape_cast %106 : vector<1x8x256xf32> to vector<8x256xf32>
    %108 = arith.addf %105, %107 : vector<8x256xf32>
    %c0_85 = arith.constant 0 : index
    %c0_86 = arith.constant 0 : index
    %c0_87 = arith.constant 0 : index
    %109 = vector.load %arg7[%c0_85, %c0_86, %c0_87] : memref<2x8x256xf32, #tpu.memory_space<vmem>>, vector<1x8x256xf32>
    %110 = vector.shape_cast %109 : vector<1x8x256xf32> to vector<8x256xf32>
    %111 = vector.shape_cast %108 : vector<8x256xf32> to vector<1x8x256xf32>
    tpu.vector_store %arg7[%c0_85, %c0_86, %c0_87], %111 {strides = array<i32>} : memref<2x8x256xf32, #tpu.memory_space<vmem>>, vector<1x8x256xf32>,
    %112 = vector.extract_strided_slice %104 {offsets = [0, 256], sizes = [8, 256], strides = [1, 1]} : vector<8x512xf32> to vector<8x256xf32>
    %c1_88 = arith.constant 1 : index
    %c0_89 = arith.constant 0 : index
    %c0_90 = arith.constant 0 : index
    %113 = vector.load %arg1[%c1_88, %c0_89, %c0_90] : memref<2x8x256xf32, #tpu.memory_space<vmem>>, vector<1x8x256xf32>
    %114 = vector.shape_cast %113 : vector<1x8x256xf32> to vector<8x256xf32>
    %115 = arith.addf %112, %114 : vector<8x256xf32>
    %c1_91 = arith.constant 1 : index
    %c0_92 = arith.constant 0 : index
    %c0_93 = arith.constant 0 : index
    %116 = vector.load %arg7[%c1_91, %c0_92, %c0_93] : memref<2x8x256xf32, #tpu.memory_space<vmem>>, vector<1x8x256xf32>
    %117 = vector.shape_cast %116 : vector<1x8x256xf32> to vector<8x256xf32>
    %118 = vector.shape_cast %115 : vector<8x256xf32> to vector<1x8x256xf32>
    tpu.vector_store %arg7[%c1_91, %c0_92, %c0_93], %118 {strides = array<i32>} : memref<2x8x256xf32, #tpu.memory_space<vmem>>, vector<1x8x256xf32>,
    return
  }
  func.func @transform_0(%arg0: i32) -> (i32, i32, i32) {
    %c0_i32 = arith.constant 0 : i32
    %c0_i32_0 = arith.constant 0 : i32
    %c0_i32_1 = arith.constant 0 : i32
    return %arg0, %c0_i32, %c0_i32_0 : i32, i32, i32
  }
  func.func @transform_1(%arg0: i32) -> (i32, i32) {
    %c0_i32 = arith.constant 0 : i32
    %c0_i32_0 = arith.constant 0 : i32
    %c0_i32_1 = arith.constant 0 : i32
    return %c0_i32, %c0_i32_0 : i32, i32
  }
  func.func @transform_2(%arg0: i32) -> (i32, i32) {
    %c0_i32 = arith.constant 0 : i32
    %c0_i32_0 = arith.constant 0 : i32
    %c0_i32_1 = arith.constant 0 : i32
    return %c0_i32, %c0_i32_0 : i32, i32
  }
  func.func @transform_3(%arg0: i32) -> (i32, i32) {
    %c0_i32 = arith.constant 0 : i32
    %c0_i32_0 = arith.constant 0 : i32
    %c0_i32_1 = arith.constant 0 : i32
    return %c0_i32, %c0_i32_0 : i32, i32
  }
  func.func @transform_4(%arg0: i32) -> (i32, i32) {
    %c0_i32 = arith.constant 0 : i32
    %c0_i32_0 = arith.constant 0 : i32
    %c0_i32_1 = arith.constant 0 : i32
    return %c0_i32, %c0_i32_0 : i32, i32
  }
  func.func @transform_5(%arg0: i32) -> (i32, i32) {
    %c0_i32 = arith.constant 0 : i32
    %c0_i32_0 = arith.constant 0 : i32
    %c0_i32_1 = arith.constant 0 : i32
    return %c0_i32, %c0_i32_0 : i32, i32
  }
  func.func @transform_6(%arg0: i32) -> (i32, i32, i32) {
    %c0_i32 = arith.constant 0 : i32
    %c0_i32_0 = arith.constant 0 : i32
    %c0_i32_1 = arith.constant 0 : i32
    return %arg0, %c0_i32, %c0_i32_0 : i32, i32, i32
  }
}

</mosaic_0001>

<bundles_post_ra>
// kernel: residual_block_forward.1
= control target key start
LH: loop header
LB: loop body
LE: loop exit
PB: predicated region body
PF: predicated region fallthrough
CT: control target
= control target key end

     0   :  { %vm29_vm0 = vcmask 549888   ;;  %vm48_vm1 = vcmask 1043456   ;;  %v1000_v3 = vmov 0   ;;  %vm44_vm2 = vcmask 64512   ;;  %s1003_s12 = smov 51   ;;  %s1004_s13 = smov 32   ;;  %s1264_s0 = inlined_call_operand.vmem [shape: f32[2,8,256], index: 0, kind: input, shape index: {}]   ;;  %s1265_s3 = inlined_call_operand.vmem [shape: f32[4,1], index: 3, kind: input, shape index: {}]   ;;  %s1266_s1 = inlined_call_operand.vmem [shape: bf16[4,8], index: 1, kind: input, shape index: {}]   ;;  %s1267_s5 = inlined_call_operand.vmem [shape: bf16[2,256], index: 5, kind: input, shape index: {}]   ;;  %s1268_s4 = inlined_call_operand.vmem [shape: f32[8,1], index: 4, kind: input, shape index: {}]   ;;  %s1269_s2 = inlined_call_operand.vmem [shape: bf16[8,36], index: 2, kind: input, shape index: {}]   ;;  %s1270_s6 = inlined_call_operand.vmem [shape: f32[2,8,256], index: 6, kind: output, shape index: {}]  }
   0x1   :  { %v34_v0 = vld [vmem:[%s1264_s0] sm:$0xff]  ;;  %v35_v1 = vld [vmem:[%s1264_s0 + $0x8] sm:$0xff]  ;;  %v918_v2 = vld [vmem:[%s1264_s0 + $0x10] sm:$0xff]  ;;  %999 = vset.pattern.permute.xlu0 %v1000_v3  ;;  %28 = vst [vmem:[#allocation2] sm:$0xff] %v1000_v3  ;;  %vm90_vm5 = vcmask 1041408   ;;  %vm101_vm8 = vcmask 1041544  }
   0x2   :  { %v37_v4 = vpack.c.bf16 %v34_v0, %v34_v0  ;;  %v38_v5 = vpack.c.bf16 %v35_v1, %v35_v1  ;;  %v111_v6 = vpack.c.bf16 %v918_v2, %v918_v2  ;;  %v919_v7 = vld [vmem:[%s1264_s0 + $0x18] sm:$0xff]  ;;  %30 = vst.msk [vmem:[#allocation2 + $0x8] sm:$0x3] %vm29_vm0, %v1000_v3  ;;  %v32_v9 = vld [vmem:[%s1265_s3] sm:$0xf]  ;;  %vm102_vm9 = vcmask 1043458  }
   0x3   :  { %v112_v8 = vpack.c.bf16 %v919_v7, %v919_v7  ;;  %41 = vperm.xlu0 %999, %v32_v9   ;;  %v36_v14 = vld [vmem:[%s1266_s1] sm:$0x3]  ;;  %vm103_vm10 = vmor %vm102_vm9, %vm101_vm8  ;;  %vm104_vm11 = vcmask 136196   ;;  %vm98_vm12 = vcmask 138240   ;;  %vm167_vm14 = vcmask 1041816   ;;  %s1005_s14 = smov 36  }
   0x4   :  { %v50_v10 = vsel %vm48_vm1, %v37_v4, 0  ;;  %v53_v11 = vsel %vm48_vm1, %v38_v5, 0  ;;  %v117_v12 = vsel %vm48_vm1, %v111_v6, 0  ;;  %v110_v15 = vld [vmem:[%s1266_s1] sm:$0x3]  ;;  %s1001_s1 = smov 16   ;;  %vm105_vm13 = vmor %vm104_vm11, %vm103_vm10 }
   0x5   :  { %62 = vmatpush.bf16.msra.mxu0 %v50_v10  ;;  %75 = vmatpush.bf16.msra.mxu1 %v53_v11  ;;  %v120_v13 = vsel %vm48_vm1, %v112_v8, 0  ;;  %v1092_v16 = vld [vmem:[%s1267_s5] sm:$0x3]  ;;  %s1002_s5 = smov 17   ;;  %vm168_vm15 = vmor %vm102_vm9, %vm167_vm14  ;;  %vm169_vm0 = vcmask 414724   ;;  %s1006_s15 = smov 18  }
   0x6   :  { %129 = vmatpush.bf16.msra.mxu2 %v117_v12  ;;  %142 = vmatpush.bf16.msra.mxu3 %v120_v13  ;;  %174 = vst [vmem:[#allocation1] ss:$9 sm:$0xff] %v1092_v16  ;;  %s1007_s16 = smov 2   ;;  %s1008_s17 = smov 66   ;;  %vm379_vm8 = vcmask 261120   ;;  %vm436_vm9 = vcmask 277504  }
   0x7   :  { %s1009_s18 = smov 34   ;;  %s1010_s19 = smov 52   ;;  %vm529_vm10 = vcmask 293888   ;;  %vm567_vm11 = vcmask 408576   ;;  %vm722_vm14 = vcmask 556032  }
   0x8   :  { %916 = vmatmul.msk.bf16.vlgmr.msra.gmra.mxu0 %vm44_vm2, %v36_v14  ;;  %917 = vmatmul.msk.bf16.vlgmr.msra.gmra.mxu1 %vm44_vm2, %v36_v14  ;;  %s1011_s20 = smov 50   ;;  %s1012_s21 = smov 68  }
   0x9   :  { %920 = vmatmul.msk.bf16.vlgmr.msra.gmra.mxu2 %vm44_vm2, %v110_v15  ;;  %921 = vmatmul.msk.bf16.vlgmr.msra.gmra.mxu3 %vm44_vm2, %v110_v15  ;;  %vm164_vm2 = vcmask 416768   ;;  %s1013_s22 = smov 111   ;;  %s1014_s23 = smov 110  }
   0xa   :  { %s1015_s24 = smov 96   ;;  %s1016_s25 = smov 94  }
   0xb   :  { %s1017_s26 = smov 95   ;;  %s1018_s27 = smov 92  }
   0xc   :  { %s1019_s28 = smov 78   ;;  %s1020_s29 = smov 93  }
   0xd   :  { %v175_v17 = vld [vmem:[#allocation1] sm:$0xff]  ;;  %v176_v18 = vld [vmem:[#allocation1 + $0x9] sm:$0xff]  ;;  %s1021_s30 = smov 76   ;;  %s1022_s7 = smov 62  }
   0xe   :  { %v177_v19 = vpack.i.b16 %v175_v17, %v175_v17  ;;  %v180_v20 = vpack.i.b16 %v176_v18, %v176_v18  ;;  %s1023_s8 = smov 60   ;;  %s1024_s9 = smov 77  }
   0xf   :  { %s1025_s3 = smov 61   ;;  %s1026_s10 = smov 127  }
  0x10   :  { %v179_v21 = vperm.slane %v177_v19, 0  ;;  %v182_v22 = vperm.slane %v180_v20, 0  ;;  %s1027_s11 = smov 126  }
  0x12   :  { %v184_v23 = vunpack.c.l.bf16 %v179_v21  ;;  %v185_v24 = vunpack.c.l.bf16 %v182_v22 }
  0x14   :  { %v188_v25 = vrot.slane %v185_v24, 4 }
  0x16   :  { %v1096_v26 = vsel %vm48_vm1, %v184_v23, %v188_v25 }
  0x17   :  { %278 = vrot.lane.b32.xlu2 %v1096_v26, %s1001_s1  ;;  %s1028_s1 = smov 112  }
  0x71   :  { %v279_v21 = vpop.permute.xlu2 %278 }
  0x75   :  { %v42_v27 = vpop.permute.xlu0 %41 }
  0x85   :  { %v64_v28 = vpop.f32.mrf.mxu0  ;;  %v77_v29 = vpop.f32.mrf.mxu1 }
  0x86   :  { %v65_v30 = vadd.f32 %v64_v28, %v42_v27  ;;  %v78_v31 = vadd.f32 %v77_v29, %v42_v27  ;;  %v280_v28 = vrot.slane %v279_v21, 4 }
  0x88   :  { %vm81_vm3 = vcmp.gt.f32.partialorder %v65_v30, 0.0  ;;  %v83_v32 = vmul.f32 0.1, %v65_v30  ;;  %vm82_vm4 = vcmp.gt.f32.partialorder %v78_v31, 0.0  ;;  %v84_v33 = vmul.f32 0.1, %v78_v31 }
  0x8a   :  { %v85_v34 = vsel %vm81_vm3, %v65_v30, %v83_v32  ;;  %v86_v35 = vsel %vm82_vm4, %v78_v31, %v84_v33  ;;  %vm170_vm3 = vmor %vm169_vm0, %vm168_vm15  ;;  %vm243_vm4 = vcmask 15360   ;;  %vm329_vm15 = vcmask 908288  }
  0x8b   :  { %v87_v36 = vpack.c.bf16 %v86_v35, %v85_v34  ;;  %vm407_vm0 = vcmask 785408  }
  0x8c   :  { %v131_v37 = vpop.f32.mrf.mxu2  ;;  %v144_v38 = vpop.f32.mrf.mxu3 }
  0x8d   :  { %v132_v39 = vadd.f32 %v131_v37, %v42_v27  ;;  %v145_v40 = vadd.f32 %v144_v38, %v42_v27  ;;  %v66_v41 = vpop.f32.mrf.mxu0  ;;  %v79_v42 = vpop.f32.mrf.mxu1  ;;  %v89_v43 = vrot.slane %v87_v36, 2 }
  0x8f   :  { %vm148_vm6 = vcmp.gt.f32.partialorder %v132_v39, 0.0  ;;  %v150_v44 = vmul.f32 0.1, %v132_v39  ;;  %vm149_vm7 = vcmp.gt.f32.partialorder %v145_v40, 0.0  ;;  %v151_v45 = vmul.f32 0.1, %v145_v40 }
  0x90   :  { %v93_v46 = vsel %vm90_vm5, %v87_v36, %v89_v43 }
  0x91   :  { %v152_v47 = vsel %vm148_vm6, %v132_v39, %v150_v44  ;;  %v153_v48 = vsel %vm149_vm7, %v145_v40, %v151_v45  ;;  %95 = vrot.lane.b32.xlu0 %v93_v46, %s1002_s5  ;;  %vm281_vm6 = vcmask 130048   ;;  %vm339_vm7 = vcmask 146432  }
  0x92   :  { %v154_v49 = vpack.c.bf16 %v153_v48, %v152_v47 }
  0x94   :  { %v133_v50 = vpop.f32.mrf.mxu2  ;;  %v146_v51 = vpop.f32.mrf.mxu3  ;;  %v156_v52 = vrot.slane %v154_v49, 2 }
  0x96   :  { %v159_v53 = vsel %vm90_vm5, %v154_v49, %v156_v52 }
  0x97   :  { %161 = vrot.lane.b32.xlu1 %v159_v53, %s1003_s12 }
  0x99   :  { %376 = vrot.lane.b32.xlu0 %v1096_v26, %s1004_s13 }
 0x103   :  { %v96_v54 = vpop.permute.xlu0 %95 }
 0x104   :  { %v97_v55 = vrot.slane %v96_v54, 6 }
 0x106   :  { %v99_v56 = vsel %vm98_vm12, %v97_v55, %v96_v54  ;;  %vm625_vm12 = vcmask 424960  }
 0x107   :  { %106 = vst.msk [vmem:[#allocation2] sm:$0x3f] %vm105_vm13, %v99_v56  ;;  %vm665_vm13 = vcmask 539648  }
 0x109   :  { %v162_v57 = vpop.permute.xlu1 %161 }
 0x10a   :  { %v163_v58 = vrot.slane %v162_v57, 6 }
 0x10b   :  { %v377_v45 = vpop.permute.xlu0 %376 }
 0x10c   :  { %v165_v59 = vsel %vm164_vm2, %v163_v58, %v162_v57  ;;  %v378_v48 = vrot.slane %v377_v45, 4  ;;  %vm369_vm2 = vcmask 900096  }
 0x10d   :  { %171 = vst.msk [vmem:[#allocation2 + $0x4] sm:$0x3f] %vm170_vm3, %v165_v59  ;;  %vm464_vm3 = vcmask 769024  }
 0x10e   :  { %v172_v60 = vld [vmem:[#allocation2] sm:$0xf] }
 0x10f   :  { %v183_v61 = vunpack.c.l.bf16 %v172_v60  ;;  %v380_v60 = vsel %vm379_vm8, %v378_v48, %v377_v45  ;;  %vm557_vm8 = vcmask 752640  }
 0x111   :  { %v191_v62 = vmul.f32 %v1096_v26, %v183_v61 }
 0x113   :  { %193 = vst [vmem:[#allocation1] ss:$2 sm:$0xff] %v191_v62 }
 0x114   :  { %v200_v63 = vld [vmem:[#allocation2] sm:$0x3f] }
 0x115   :  { %v275_v27 = vld [vmem:[#allocation2] sm:$0x3f] }
 0x116   :  { %v276_v29 = vunpack.c.l.bf16 %v275_v27  ;;  %v277_v30 = vunpack.c.h.bf16 %v275_v27  ;;  %v333_v37 = vld [vmem:[#allocation2] sm:$0x3f] }
 0x117   :  { %v335_v39 = vunpack.c.h.bf16 %v333_v37  ;;  %v315_v40 = vld [vmem:[#allocation2] sm:$0x3f]  ;;  %v334_v50 = vunpack.c.l.bf16 %v333_v37 }
 0x118   :  { %v286_v33 = vmul.f32 %v280_v28, %v277_v30  ;;  %v373_v41 = vld [vmem:[#allocation2] sm:$0x3f] }
 0x119   :  { %v375_v47 = vunpack.c.h.bf16 %v373_v41  ;;  %v374_v57 = vunpack.c.l.bf16 %v373_v41  ;;  %v430_v58 = vld [vmem:[#allocation2] sm:$0x3f] }
 0x11a   :  { %v194_v0 = vld.sshfl [vmem:[#allocation1] sm:$0xff pattern:$0x75316420]  ;;  %v195_v1 = vld.sshfl [vmem:[#allocation1 + $0x8] sm:$0xff pattern:$0x75316420]  ;;  %v432_v62 = vunpack.c.h.bf16 %v430_v58 }
 0x11b   :  { %203 = vst [vmem:[#allocation1 + $0x1] ss:$2 sm:$0xff] %v200_v63  ;;  %v198_v2 = vpack.c.bf16 %v195_v1, %v194_v0  ;;  %v384_v52 = vmul.f32 %v378_v48, %v375_v47  ;;  %v383_v63 = vmul.f32 %v380_v60, %v374_v57  ;;  %v1138_v37 = vld [vmem:[#allocation2 + $0x4] sm:$0x3f] }
 0x11c   :  { %v563_v41 = vunpack.c.h.bf16 %v1138_v37 }
 0x11d   :  { %199 = vst [vmem:[#allocation3] sm:$0x33] %v198_v2 }
 0x122   :  { %v1103_v3 = vld.sshfl [vmem:[#allocation1] sm:$0xff pattern:$0x75643120]  ;;  %v1105_v4 = vld.sshfl [vmem:[#allocation1 + $0x8] sm:$0xff pattern:$0x75643120] }
 0x123   :  { %221 = vst [vmem:[#allocation1] ss:$9 sm:$0xff] %v1092_v16  ;;  %v220_v16 = vld [vmem:[#allocation2] sm:$0x3f] }
 0x124   :  { %v233_v19 = vunpack.c.h.bf16 %v220_v16  ;;  %v232_v22 = vunpack.c.l.bf16 %v220_v16 }
 0x12a   :  { %v222_v5 = vld [vmem:[#allocation1] sm:$0xff]  ;;  %v223_v6 = vld [vmem:[#allocation1 + $0x9] sm:$0xff] }
 0x12b   :  { %v224_v7 = vshrl.u32 %v222_v5, 16  ;;  %v228_v8 = vshrl.u32 %v223_v6, 16 }
 0x12d   :  { %v225_v9 = vpack.i.b16 %v224_v7, %v224_v7  ;;  %v229_v10 = vpack.i.b16 %v228_v8, %v228_v8 }
 0x12f   :  { %v227_v11 = vperm.slane %v225_v9, 0  ;;  %v231_v12 = vperm.slane %v229_v10, 0  ;;  %v468_v9 = vld [vmem:[#allocation2 + $0x4] sm:$0x3f] }
 0x131   :  { %v235_v13 = vunpack.c.l.bf16 %v231_v12  ;;  %v234_v14 = vunpack.c.l.bf16 %v227_v11  ;;  %v470_v11 = vunpack.c.h.bf16 %v468_v9 }
 0x133   :  { %v238_v15 = vrot.slane %v235_v13, 4  ;;  %v411_v13 = vld [vmem:[#allocation2] sm:$0x3f] }
 0x135   :  { %v239_v17 = vsel %vm48_vm1, %v234_v14, %v238_v15 }
 0x136   :  { %526 = vrot.lane.b32.xlu0 %v239_v17, %s1005_s14  ;;  %336 = vrot.lane.b32.xlu2 %v239_v17, %s1006_s15 }
 0x137   :  { %240 = vrot.lane.b32.xlu1 %v239_v17, %s1007_s16 }
 0x13e   :  { %662 = vrot.lane.b32.xlu0 %v1096_v26, %s1008_s17  ;;  %471 = vrot.lane.b32.xlu2 %v1096_v26, %s1009_s18 }
 0x13f   :  { %433 = vrot.lane.b32.xlu1 %v239_v17, %s1009_s18 }
 0x146   :  { %622 = vrot.lane.b32.xlu2 %v239_v17, %s1010_s19 }
 0x147   :  { %564 = vrot.lane.b32.xlu1 %v1096_v26, %s1011_s20  ;;  %v282_v26 = vsel %vm281_vm6, %v280_v28, %v279_v21  ;;  %v1127_v21 = vld [vmem:[#allocation2 + $0x4] sm:$0x3f]  ;;  %vm519_vm6 = vcmask 760832  }
 0x148   :  { %v285_v31 = vmul.f32 %v282_v26, %v276_v29 }
 0x14f   :  { %719 = vrot.lane.b32.xlu1 %v239_v17, %s1012_s21 }
 0x190   :  { %v337_v36 = vpop.permute.xlu2 %336 }
 0x191   :  { %v338_v38 = vrot.slane %v337_v36, 4 }
 0x193   :  { %v344_v42 = vmul.f32 %v338_v38, %v335_v39  ;;  %v340_v49 = vsel %vm339_vm7, %v338_v38, %v337_v36  ;;  %vm655_vm7 = vcmask 621568  }
 0x194   :  { %v343_v51 = vmul.f32 %v340_v49, %v334_v50 }
 0x198   :  { %v472_v6 = vpop.permute.xlu2 %471 }
 0x199   :  { %v473_v10 = vrot.slane %v472_v6, 4 }
 0x19b   :  { %v478_v14 = vmul.f32 %v473_v10, %v470_v11  ;;  %v474_v38 = vsel %vm436_vm9, %v473_v10, %v472_v6  ;;  %v524_v6 = vunpack.c.l.bf16 %v1127_v21 }
 0x1a0   :  { %v1145_v49 = vpop.permute.xlu2 %622 }
 0x1a8   :  { %v1125_v16 = vpop.permute.xlu0 %526 }
 0x1a9   :  { %v241_v18 = vpop.permute.xlu1 %240 }
 0x1aa   :  { %v242_v20 = vrot.slane %v241_v18, 4 }
 0x1ac   :  { %v244_v23 = vsel %vm243_vm4, %v242_v20, %v241_v18  ;;  %v248_v24 = vmul.f32 %v242_v20, %v233_v19  ;;  %vm597_vm4 = vcmask 637952  }
 0x1ad   :  { %v247_v25 = vmul.f32 %v244_v23, %v232_v22  ;;  %v528_v22 = vrot.slane %v1125_v16, 4 }
 0x1ae   :  { %253 = vst [vmem:[#allocation1 + $0x10] ss:$2 sm:$0xff] %v248_v24  ;;  %v431_v24 = vunpack.c.l.bf16 %v430_v58 }
 0x1af   :  { %251 = vst [vmem:[#allocation1] ss:$2 sm:$0xff] %v247_v25  ;;  %v525_v25 = vunpack.c.h.bf16 %v1127_v21 }
 0x1b1   :  { %v434_v55 = vpop.permute.xlu1 %433  ;;  %v534_v28 = vmul.f32 %v528_v22, %v525_v25 }
 0x1b2   :  { %v435_v61 = vrot.slane %v434_v55, 4 }
 0x1b4   :  { %v441_v1 = vmul.f32 %v435_v61, %v432_v62  ;;  %v437_v23 = vsel %vm436_vm9, %v435_v61, %v434_v55  ;;  %v504_v55 = vld [vmem:[#allocation2 + $0x4] sm:$0x3f]  ;;  %vm615_vm9 = vcmask 629760  }
 0x1b5   :  { %v1112_v32 = vld.sshfl [vmem:[#allocation1 + $0x10] sm:$0xff pattern:$0x75316420]  ;;  %v440_v27 = vmul.f32 %v437_v23, %v431_v24 }
 0x1b6   :  { %v1114_v34 = vld.sshfl [vmem:[#allocation1] sm:$0xff pattern:$0x75316420]  ;;  %v1116_v35 = vld.sshfl [vmem:[#allocation1 + $0x8] sm:$0xff pattern:$0x75316420] }
 0x1b7   :  { %289 = vst [vmem:[#allocation1] ss:$2 sm:$0xff] %v285_v31 }
 0x1b8   :  { %291 = vst [vmem:[#allocation1 + $0x10] ss:$2 sm:$0xff] %v286_v33 }
 0x1b9   :  { %v1135_v26 = vpop.permute.xlu1 %564 }
 0x1ba   :  { %v566_v39 = vrot.slane %v1135_v26, 4 }
 0x1bc   :  { %v572_v45 = vmul.f32 %v566_v39, %v563_v41 }
 0x1be   :  { %v1118_v43 = vld.sshfl [vmem:[#allocation1] sm:$0xff pattern:$0x75316420]  ;;  %v1120_v44 = vld.sshfl [vmem:[#allocation1 + $0x8] sm:$0xff pattern:$0x75316420] }
 0x1bf   :  { %v1122_v46 = vld.sshfl [vmem:[#allocation1 + $0x10] sm:$0xff pattern:$0x75316420]  ;;  %317 = vst [vmem:[#allocation1] ss:$2 sm:$0xff] %v315_v40  ;;  %v469_v40 = vunpack.c.l.bf16 %v468_v9 }
 0x1c0   :  { %349 = vst [vmem:[#allocation1 + $0x10] ss:$2 sm:$0xff] %v344_v42 }
 0x1c1   :  { %v477_v42 = vmul.f32 %v474_v38, %v469_v40 }
 0x1c6   :  { %v320_v53 = vld.sshfl [vmem:[#allocation1 + $0x8] sm:$0xff pattern:$0x75643120]  ;;  %v318_v54 = vld.sshfl [vmem:[#allocation1] sm:$0xff pattern:$0x75643120] }
 0x1c7   :  { %324 = vrot.lane.b32.xlu2 %v320_v53, %s1013_s22  ;;  %322 = vrot.lane.b32.xlu1 %v318_v54, %s1013_s22  ;;  %347 = vst [vmem:[#allocation1] ss:$2 sm:$0xff] %v343_v51  ;;  %v352_v56 = vld.sshfl [vmem:[#allocation1 + $0x10] sm:$0xff pattern:$0x75316420]  ;;  %v624_v53 = vrot.slane %v1145_v49, 4 }
 0x1c8   :  { %389 = vst [vmem:[#allocation1 + $0x10] ss:$2 sm:$0xff] %v384_v52  ;;  %v357_v59 = vpack.c.bf16 %v352_v56, %v352_v56  ;;  %v1147_v52 = vld [vmem:[#allocation2 + $0x4] sm:$0x3f] }
 0x1c9   :  { %v621_v54 = vunpack.c.h.bf16 %v1147_v52  ;;  %v626_v38 = vsel %vm625_vm12, %v624_v53, %v1145_v49  ;;  %v620_v40 = vunpack.c.l.bf16 %v1147_v52  ;;  %vm426_vm12 = vcmask 777216  }
 0x1ca   :  { %v361_v0 = vrot.slane %v357_v59, 6  ;;  %v1154_v59 = vpop.permute.xlu0 %662 }
 0x1cb   :  { %v630_v56 = vmul.f32 %v624_v53, %v621_v54  ;;  %v629_v41 = vmul.f32 %v626_v38, %v620_v40  ;;  %v697_v54 = vld [vmem:[#allocation2 + $0x4] sm:$0x3f] }
 0x1ce   :  { %v350_v2 = vld.sshfl [vmem:[#allocation1] sm:$0xff pattern:$0x75316420]  ;;  %v351_v5 = vld.sshfl [vmem:[#allocation1 + $0x8] sm:$0xff pattern:$0x75316420] }
 0x1cf   :  { %364 = vrot.lane.b32.xlu1 %v361_v0, %s1014_s23  ;;  %v392_v7 = vld.sshfl [vmem:[#allocation1 + $0x10] sm:$0xff pattern:$0x75316420]  ;;  %387 = vst [vmem:[#allocation1] ss:$2 sm:$0xff] %v383_v63  ;;  %v356_v12 = vpack.c.bf16 %v351_v5, %v350_v2  ;;  %v664_v2 = vrot.slane %v1154_v59, 4 }
 0x1d0   :  { %v397_v8 = vpack.c.bf16 %v392_v7, %v392_v7  ;;  %446 = vst [vmem:[#allocation1 + $0x10] ss:$2 sm:$0xff] %v441_v1  ;;  %v1156_v0 = vld [vmem:[#allocation2 + $0x4] sm:$0x3f]  ;;  %v530_v1 = vsel %vm529_vm10, %v528_v22, %v1125_v16 }
 0x1d1   :  { %v360_v20 = vrot.slane %v356_v12, 6  ;;  %v661_v7 = vunpack.c.h.bf16 %v1156_v0  ;;  %v1166_v12 = vpop.permute.xlu1 %719 }
 0x1d2   :  { %402 = vrot.lane.b32.xlu0 %v397_v8, %s1015_s24  ;;  %v533_v8 = vmul.f32 %v530_v1, %v524_v6  ;;  %v721_v16 = vrot.slane %v1166_v12, 4  ;;  %v261_v6 = vpack.c.bf16 %v1112_v32, %v1112_v32 }
 0x1d3   :  { %v670_v9 = vmul.f32 %v664_v2, %v661_v7 }
 0x1d6   :  { %v390_v15 = vld.sshfl [vmem:[#allocation1] sm:$0xff pattern:$0x75316420]  ;;  %v391_v17 = vld.sshfl [vmem:[#allocation1 + $0x8] sm:$0xff pattern:$0x75316420] }
 0x1d7   :  { %v449_v18 = vld.sshfl [vmem:[#allocation1 + $0x10] sm:$0xff pattern:$0x75316420]  ;;  %414 = vst [vmem:[#allocation1 + $0x1] ss:$2 sm:$0xff] %v411_v13  ;;  %v396_v36 = vpack.c.bf16 %v391_v17, %v390_v15  ;;  %v568_v17 = vsel %vm567_vm11, %v566_v39, %v1135_v26  ;;  %vm750_vm11 = vcmask 490496  }
 0x1d8   :  { %v454_v19 = vpack.c.bf16 %v449_v18, %v449_v18  ;;  %483 = vst [vmem:[#allocation1 + $0x10] ss:$2 sm:$0xff] %v478_v14  ;;  %v1168_v15 = vld [vmem:[#allocation2 + $0x4] sm:$0x3f] }
 0x1da   :  { %459 = vrot.lane.b32.xlu2 %v454_v19, %s1016_s25  ;;  %362 = vrot.lane.b32.xlu0 %v360_v20, %s1014_s23  ;;  %v562_v19 = vunpack.c.l.bf16 %v1138_v37  ;;  %v718_v20 = vunpack.c.h.bf16 %v1168_v15 }
 0x1dc   :  { %v571_v21 = vmul.f32 %v568_v17, %v562_v19  ;;  %v727_v22 = vmul.f32 %v721_v16, %v718_v20 }
 0x1de   :  { %v415_v29 = vld.sshfl [vmem:[#allocation1] sm:$0xff pattern:$0x75643120]  ;;  %v1133_v30 = vld.sshfl [vmem:[#allocation1 + $0x8] sm:$0xff pattern:$0x75643120] }
 0x1df   :  { %419 = vrot.lane.b32.xlu1 %v415_v29, %s1017_s26  ;;  %444 = vst [vmem:[#allocation1] ss:$2 sm:$0xff] %v440_v27  ;;  %v486_v31 = vld.sshfl [vmem:[#allocation1 + $0x10] sm:$0xff pattern:$0x75316420] }
 0x1e0   :  { %v491_v33 = vpack.c.bf16 %v486_v31, %v486_v31  ;;  %539 = vst [vmem:[#allocation1 + $0x10] ss:$2 sm:$0xff] %v534_v28  ;;  %v601_v29 = vld [vmem:[#allocation2 + $0x4] sm:$0x3f] }
 0x1e2   :  { %496 = vrot.lane.b32.xlu0 %v491_v33, %s1016_s25  ;;  %400 = vrot.lane.b32.xlu2 %v396_v36, %s1015_s24 }
 0x1e6   :  { %v447_v47 = vld.sshfl [vmem:[#allocation1] sm:$0xff pattern:$0x75316420]  ;;  %v448_v48 = vld.sshfl [vmem:[#allocation1 + $0x8] sm:$0xff pattern:$0x75316420] }
 0x1e7   :  { %v542_v50 = vld.sshfl [vmem:[#allocation1 + $0x10] sm:$0xff pattern:$0x75316420]  ;;  %481 = vst [vmem:[#allocation1] ss:$2 sm:$0xff] %v477_v42  ;;  %v453_v62 = vpack.c.bf16 %v448_v48, %v447_v47  ;;  %v666_v47 = vsel %vm665_vm13, %v664_v2, %v1154_v59  ;;  %v660_v48 = vunpack.c.l.bf16 %v1156_v0  ;;  %v717_v59 = vunpack.c.l.bf16 %v1168_v15 }
 0x1e8   :  { %v547_v51 = vpack.c.bf16 %v542_v50, %v542_v50  ;;  %577 = vst [vmem:[#allocation1 + $0x10] ss:$2 sm:$0xff] %v572_v45  ;;  %vm693_vm13 = vcmask 506880  }
 0x1e9   :  { %v669_v49 = vmul.f32 %v666_v47, %v660_v48 }
 0x1ea   :  { %552 = vrot.lane.b32.xlu1 %v547_v51, %s1018_s27 }
 0x1ee   :  { %v484_v57 = vld.sshfl [vmem:[#allocation1] sm:$0xff pattern:$0x75316420]  ;;  %v485_v58 = vld.sshfl [vmem:[#allocation1 + $0x8] sm:$0xff pattern:$0x75316420] }
 0x1ef   :  { %v490_v60 = vpack.c.bf16 %v485_v58, %v484_v57  ;;  %507 = vst [vmem:[#allocation1 + $0x1] ss:$2 sm:$0xff] %v504_v55  ;;  %v580_v61 = vld.sshfl [vmem:[#allocation1 + $0x10] sm:$0xff pattern:$0x75316420]  ;;  %v723_v58 = vsel %vm722_vm14, %v721_v16, %v1166_v12  ;;  %vm712_vm14 = vcmask 498688  }
 0x1f0   :  { %v585_v63 = vpack.c.bf16 %v580_v61, %v580_v61  ;;  %635 = vst [vmem:[#allocation1 + $0x10] ss:$2 sm:$0xff] %v630_v56 }
 0x1f1   :  { %494 = vrot.lane.b32.xlu2 %v490_v60, %s1016_s25  ;;  %v726_v60 = vmul.f32 %v723_v58, %v717_v59 }
 0x1f2   :  { %457 = vrot.lane.b32.xlu1 %v453_v62, %s1016_s25  ;;  %v589_v5 = vrot.slane %v585_v63, 6 }
 0x1f4   :  { %592 = vrot.lane.b32.xlu0 %v589_v5, %s1019_s28  ;;  %v298_v5 = vpack.c.bf16 %v1120_v44, %v1118_v43  ;;  %v33_v43 = vld [vmem:[%s1268_s4] sm:$0xff]  ;;  %v260_v44 = vpack.c.bf16 %v1116_v35, %v1114_v34 }
 0x1f6   :  { %v508_v10 = vld.sshfl [vmem:[#allocation1] sm:$0xff pattern:$0x75643120]  ;;  %v510_v11 = vld.sshfl [vmem:[#allocation1 + $0x8] sm:$0xff pattern:$0x75643120] }
 0x1f7   :  { %537 = vst [vmem:[#allocation1] ss:$2 sm:$0xff] %v533_v8  ;;  %v638_v13 = vld.sshfl [vmem:[#allocation1 + $0x10] sm:$0xff pattern:$0x75316420]  ;;  %v302_v7 = vrot.slane %v298_v5, 6 }
 0x1f8   :  { %v643_v14 = vpack.c.bf16 %v638_v13, %v638_v13  ;;  %675 = vst [vmem:[#allocation1 + $0x10] ss:$2 sm:$0xff] %v670_v9 }
 0x1f9   :  { %514 = vrot.lane.b32.xlu2 %v510_v11, %s1020_s29 }
 0x1fa   :  { %512 = vrot.lane.b32.xlu1 %v508_v10, %s1020_s29  ;;  %v647_v18 = vrot.slane %v643_v14, 6 }
 0x1fc   :  { %650 = vrot.lane.b32.xlu0 %v647_v18, %s1021_s30 }
 0x1fe   :  { %v540_v23 = vld.sshfl [vmem:[#allocation1] sm:$0xff pattern:$0x75316420]  ;;  %v541_v24 = vld.sshfl [vmem:[#allocation1 + $0x8] sm:$0xff pattern:$0x75316420] }
 0x1ff   :  { %v678_v25 = vld.sshfl [vmem:[#allocation1 + $0x10] sm:$0xff pattern:$0x75316420]  ;;  %575 = vst [vmem:[#allocation1] ss:$2 sm:$0xff] %v571_v21  ;;  %v546_v28 = vpack.c.bf16 %v541_v24, %v540_v23 }
 0x200   :  { %v683_v27 = vpack.c.bf16 %v678_v25, %v678_v25  ;;  %732 = vst [vmem:[#allocation1 + $0x10] ss:$2 sm:$0xff] %v727_v22 }
 0x202   :  { %688 = vrot.lane.b32.xlu2 %v683_v27, %s1022_s7 }
 0x204   :  { %550 = vrot.lane.b32.xlu0 %v546_v28, %s1018_s27 }
 0x206   :  { %v578_v26 = vld.sshfl [vmem:[#allocation1] sm:$0xff pattern:$0x75316420]  ;;  %v579_v31 = vld.sshfl [vmem:[#allocation1 + $0x8] sm:$0xff pattern:$0x75316420] }
 0x207   :  { %v735_v33 = vld.sshfl [vmem:[#allocation1 + $0x10] sm:$0xff pattern:$0x75316420]  ;;  %v584_v36 = vpack.c.bf16 %v579_v31, %v578_v26  ;;  %603 = vst [vmem:[#allocation1] ss:$2 sm:$0xff] %v601_v29 }
 0x208   :  { %v740_v39 = vpack.c.bf16 %v735_v33, %v735_v33 }
 0x209   :  { %v588_v37 = vrot.slane %v584_v36, 6 }
 0x20b   :  { %590 = vrot.lane.b32.xlu2 %v588_v37, %s1019_s28 }
 0x20c   :  { %745 = vrot.lane.b32.xlu0 %v740_v39, %s1023_s8 }
 0x20e   :  { %v606_v42 = vld.sshfl [vmem:[#allocation1 + $0x8] sm:$0xff pattern:$0x75643120]  ;;  %v604_v45 = vld.sshfl [vmem:[#allocation1] sm:$0xff pattern:$0x75643120] }
 0x20f   :  { %610 = vrot.lane.b32.xlu1 %v606_v42, %s1024_s9  ;;  %633 = vst [vmem:[#allocation1] ss:$2 sm:$0xff] %v629_v41 }
 0x214   :  { %608 = vrot.lane.b32.xlu0 %v604_v45, %s1024_s9 }
 0x216   :  { %v636_v50 = vld.sshfl [vmem:[#allocation1] sm:$0xff pattern:$0x75316420]  ;;  %v637_v51 = vld.sshfl [vmem:[#allocation1 + $0x8] sm:$0xff pattern:$0x75316420] }
 0x217   :  { %v642_v52 = vpack.c.bf16 %v637_v51, %v636_v50  ;;  %673 = vst [vmem:[#allocation1] ss:$2 sm:$0xff] %v669_v49 }
 0x219   :  { %v646_v53 = vrot.slane %v642_v52, 6 }
 0x21b   :  { %648 = vrot.lane.b32.xlu2 %v646_v53, %s1021_s30 }
 0x21e   :  { %v676_v55 = vld.sshfl [vmem:[#allocation1] sm:$0xff pattern:$0x75316420]  ;;  %v677_v56 = vld.sshfl [vmem:[#allocation1 + $0x8] sm:$0xff pattern:$0x75316420] }
 0x21f   :  { %v682_v57 = vpack.c.bf16 %v677_v56, %v676_v55  ;;  %700 = vst [vmem:[#allocation1 + $0x1] ss:$2 sm:$0xff] %v697_v54 }
 0x221   :  { %686 = vrot.lane.b32.xlu1 %v682_v57, %s1022_s7  ;;  %v325_v2 = vpop.permute.xlu2 %324 }
 0x226   :  { %v701_v61 = vld.sshfl [vmem:[#allocation1] sm:$0xff pattern:$0x75643120]  ;;  %v703_v62 = vld.sshfl [vmem:[#allocation1 + $0x8] sm:$0xff pattern:$0x75643120] }
 0x227   :  { %705 = vrot.lane.b32.xlu0 %v701_v61, %s1025_s3  ;;  %730 = vst [vmem:[#allocation1] ss:$2 sm:$0xff] %v726_v60 }
 0x229   :  { %707 = vrot.lane.b32.xlu1 %v703_v62, %s1025_s3 }
 0x22e   :  { %v733_v63 = vld.sshfl [vmem:[#allocation1] sm:$0xff pattern:$0x75316420]  ;;  %v734_v0 = vld.sshfl [vmem:[#allocation1 + $0x8] sm:$0xff pattern:$0x75316420] }
 0x22f   :  { %208 = vrot.lane.b32.xlu0 %v1103_v3, %s1026_s10  ;;  %v739_v1 = vpack.c.bf16 %v734_v0, %v733_v63  ;;  %v327_v3 = vrot.slane %v325_v2, 4 }
 0x231   :  { %743 = vrot.lane.b32.xlu2 %v739_v1, %s1023_s8  ;;  %210 = vrot.lane.b32.xlu1 %v1105_v4, %s1026_s10 }
 0x234   :  { %v460_v8 = vpop.permute.xlu2 %459 }
 0x235   :  { %v462_v36 = vrot.slane %v460_v8, 4 }
 0x237   :  { %266 = vrot.lane.b32.xlu0 %v261_v6, %s1027_s11 }
 0x239   :  { %v323_v9 = vpop.permute.xlu1 %322  ;;  %421 = vrot.lane.b32.xlu2 %v1133_v30, %s1017_s26  ;;  %304 = vrot.lane.b32.xlu1 %v302_v7, %s1028_s1  ;;  %v299_v30 = vpack.c.bf16 %v1122_v46, %v1122_v46 }
 0x23a   :  { %v326_v10 = vrot.slane %v323_v9, 4 }
 0x23b   :  { %v303_v17 = vrot.slane %v299_v30, 6 }
 0x23c   :  { %v328_v4 = vsel %vm48_vm1, %v326_v10, %v327_v3  ;;  %v401_v11 = vpop.permute.xlu2 %400 }
 0x23d   :  { %v330_v32 = vsel %vm329_vm15, %v323_v9, %v328_v4  ;;  %v404_v13 = vrot.slane %v401_v11, 4  ;;  %vm216_vm15 = vcmask 1039360  }
 0x23e   :  { %332 = vst [vmem:[#allocation3 + $0x20] sm:$0x33] %v330_v32 }
 0x23f   :  { %767 = vperm.xlu0 %999, %v33_v43  }
 0x241   :  { %264 = vrot.lane.b32.xlu2 %v260_v44, %s1027_s11  ;;  %v365_v18 = vpop.permute.xlu1 %364 }
 0x242   :  { %v367_v21 = vrot.slane %v365_v18, 4 }
 0x244   :  { %v403_v12 = vpop.permute.xlu0 %402 }
 0x245   :  { %v405_v14 = vrot.slane %v403_v12, 4 }
 0x247   :  { %v406_v15 = vsel %vm48_vm1, %v404_v13, %v405_v14 }
 0x248   :  { %v408_v16 = vsel %vm407_vm0, %v401_v11, %v406_v15  ;;  %vm311_vm0 = vcmask 916480  }
 0x249   :  { %410 = vst [vmem:[#allocation3 + $0x30] sm:$0x33] %v408_v16  ;;  %306 = vrot.lane.b32.xlu2 %v303_v17, %s1028_s1 }
 0x24b   :  { %v495_v19 = vpop.permute.xlu2 %494 }
 0x24c   :  { %v363_v20 = vpop.permute.xlu0 %362  ;;  %v498_v25 = vrot.slane %v495_v19, 4 }
 0x24d   :  { %v366_v34 = vrot.slane %v363_v20, 4 }
 0x24f   :  { %v368_v35 = vsel %vm48_vm1, %v366_v34, %v367_v21 }
 0x250   :  { %v370_v22 = vsel %vm369_vm2, %v363_v20, %v368_v35 }
 0x251   :  { %372 = vst [vmem:[#allocation3 + $0x20] sm:$0xcc] %v370_v22  ;;  %v1208_v46 = vpop.permute.xlu1 %419 }
 0x252   :  { %v423_v17 = vrot.slane %v1208_v46, 4 }
 0x253   :  { %v515_v23 = vpop.permute.xlu2 %514 }
 0x254   :  { %v497_v24 = vpop.permute.xlu0 %496  ;;  %v517_v50 = vrot.slane %v515_v23, 4 }
 0x255   :  { %v499_v27 = vrot.slane %v497_v24, 4 }
 0x257   :  { %v500_v28 = vsel %vm48_vm1, %v498_v25, %v499_v27 }
 0x258   :  { %v501_v29 = vsel %vm464_vm3, %v495_v19, %v500_v28 }
 0x259   :  { %503 = vst [vmem:[#allocation3 + $0x8] sm:$0x33] %v501_v29 }
 0x25c   :  { %v553_v26 = vpop.permute.xlu1 %552  ;;  %v1211_v31 = vpop.permute.xlu2 %688 }
 0x25d   :  { %v555_v2 = vrot.slane %v553_v26, 4  ;;  %v691_v16 = vrot.slane %v1211_v31, 4 }
 0x264   :  { %v458_v33 = vpop.permute.xlu1 %457 }
 0x265   :  { %v461_v37 = vrot.slane %v458_v33, 4  ;;  %v591_v38 = vpop.permute.xlu2 %590 }
 0x266   :  { %v593_v39 = vpop.permute.xlu0 %592  ;;  %v594_v40 = vrot.slane %v591_v38, 4 }
 0x267   :  { %v463_v41 = vsel %vm48_vm1, %v461_v37, %v462_v36  ;;  %v595_v42 = vrot.slane %v593_v39, 4  ;;  %v940_v39 = vld [vmem:[#allocation3 + $0x20] sm:$0xf] }
 0x268   :  { %v465_v45 = vsel %vm464_vm3, %v458_v33, %v463_v41 }
 0x269   :  { %467 = vst [vmem:[#allocation3 + $0x40] sm:$0x33] %v465_v45  ;;  %v596_v47 = vsel %vm48_vm1, %v594_v40, %v595_v42  ;;  %v966_v45 = vld [vmem:[#allocation3 + $0x24] sm:$0xf] }
 0x26a   :  { %v598_v48 = vsel %vm597_vm4, %v591_v38, %v596_v47 }
 0x26b   :  { %600 = vst [vmem:[#allocation3 + $0x18] sm:$0xcc] %v598_v48 }
 0x26c   :  { %v513_v49 = vpop.permute.xlu1 %512 }
 0x26d   :  { %v516_v51 = vrot.slane %v513_v49, 4 }
 0x26e   :  { %v651_v52 = vpop.permute.xlu0 %650 }
 0x26f   :  { %v518_v53 = vsel %vm48_vm1, %v516_v51, %v517_v50  ;;  %v653_v63 = vrot.slane %v651_v52, 4 }
 0x270   :  { %v520_v54 = vsel %vm519_vm6, %v513_v49, %v518_v53  ;;  %v763_v55 = vld [vmem:[#allocation3 + $0x40] sm:$0x33] }
 0x271   :  { %522 = vst [vmem:[#allocation3 + $0x8] sm:$0xcc] %v520_v54  ;;  %v796_v56 = vunpack.c.l.b16 %v763_v55  ;;  %v797_v57 = vunpack.c.h.b16 %v763_v55 }
 0x273   :  { %v808_v58 = vpack.c.b16 %v796_v56, %v796_v56  ;;  %v809_v59 = vpack.c.b16 %v797_v57, %v797_v57 }
 0x275   :  { %v824_v60 = vsel %vm90_vm5, %v808_v58, 0  ;;  %v827_v61 = vsel %vm90_vm5, %v809_v59, 0  ;;  %v649_v62 = vpop.permute.xlu2 %648 }
 0x276   :  { %840 = vmatpush.bf16.msrb.mxu0 %v824_v60  ;;  %853 = vmatpush.bf16.msrb.mxu1 %v827_v61  ;;  %v551_v0 = vpop.permute.xlu0 %550  ;;  %v652_v1 = vrot.slane %v649_v62, 4 }
 0x277   :  { %v554_v5 = vrot.slane %v551_v0, 4 }
 0x278   :  { %v654_v6 = vsel %vm48_vm1, %v652_v1, %v653_v63 }
 0x279   :  { %v556_v7 = vsel %vm48_vm1, %v554_v5, %v555_v2  ;;  %v656_v8 = vsel %vm655_vm7, %v649_v62, %v654_v6  ;;  %v932_v2 = vld [vmem:[#allocation3 + $0x8] sm:$0xf] }
 0x27a   :  { %v558_v9 = vsel %vm557_vm8, %v551_v0, %v556_v7  ;;  %658 = vst [vmem:[#allocation3 + $0x28] sm:$0xcc] %v656_v8  ;;  %v963_v7 = vld [vmem:[#allocation3 + $0xc] sm:$0xf] }
 0x27b   :  { %560 = vst [vmem:[#allocation3 + $0x18] sm:$0x33] %v558_v9 }
 0x27e   :  { %v746_v3 = vpop.permute.xlu0 %745 }
 0x27f   :  { %v748_v12 = vrot.slane %v746_v3, 4 }
 0x281   :  { %v611_v10 = vpop.permute.xlu1 %610 }
 0x282   :  { %v613_v43 = vrot.slane %v611_v10, 4  ;;  %v965_v62 = vld [vmem:[#allocation3 + $0x14] sm:$0xf0]  ;;  %v934_v63 = vld [vmem:[#allocation3 + $0x18] sm:$0xf0] }
 0x283   :  { %v933_v9 = vor.u32 %v965_v62, %v932_v2  ;;  %v937_v3 = vor.u32 %v963_v7, %v934_v63 }
 0x286   :  { %v609_v4 = vpop.permute.xlu0 %608 }
 0x287   :  { %v612_v32 = vrot.slane %v609_v4, 4 }
 0x289   :  { %v614_v44 = vsel %vm48_vm1, %v612_v32, %v613_v43 }
 0x28a   :  { %v616_v11 = vsel %vm615_vm9, %v609_v4, %v614_v44 }
 0x28b   :  { %618 = vst [vmem:[#allocation3 + $0x28] sm:$0x33] %v616_v11  ;;  %v744_v30 = vpop.permute.xlu2 %743  ;;  %v754_v11 = vld [vmem:[%s1269_s2] sm:$0xf] }
 0x28c   :  { %v747_v13 = vrot.slane %v744_v30, 4 }
 0x28e   :  { %v749_v14 = vsel %vm48_vm1, %v747_v13, %v748_v12 }
 0x28f   :  { %v751_v15 = vsel %vm750_vm11, %v744_v30, %v749_v14 }
 0x290   :  { %753 = vst [vmem:[#allocation3 + $0x48] sm:$0x33] %v751_v15 }
 0x292   :  { %v948_v55 = vld [vmem:[#allocation3 + $0x28] sm:$0xf]  ;;  %v967_v58 = vld [vmem:[#allocation3 + $0x2c] sm:$0xf] }
 0x293   :  { %v422_v18 = vpop.permute.xlu2 %421  ;;  %v687_v19 = vpop.permute.xlu1 %686 }
 0x294   :  { %v424_v20 = vrot.slane %v422_v18, 4  ;;  %v690_v21 = vrot.slane %v687_v19, 4 }
 0x296   :  { %v425_v34 = vsel %vm48_vm1, %v423_v17, %v424_v20  ;;  %v692_v35 = vsel %vm48_vm1, %v690_v21, %v691_v16 }
 0x297   :  { %v427_v22 = vsel %vm426_vm12, %v1208_v46, %v425_v34  ;;  %v694_v23 = vsel %vm693_vm13, %v687_v19, %v692_v35  ;;  %v764_v24 = vld [vmem:[#allocation3 + $0x48] sm:$0x33]  ;;  %v958_v35 = vld [vmem:[%s1264_s0 + $0x10] sm:$0xff] }
 0x298   :  { %429 = vst [vmem:[#allocation3 + $0x30] sm:$0xcc] %v427_v22  ;;  %v798_v25 = vunpack.c.l.b16 %v764_v24  ;;  %v799_v27 = vunpack.c.h.b16 %v764_v24  ;;  %v959_v22 = vld [vmem:[%s1264_s0 + $0x18] sm:$0xff] }
 0x299   :  { %696 = vst [vmem:[#allocation3 + $0x38] sm:$0x33] %v694_v23  ;;  %v706_v28 = vpop.permute.xlu0 %705 }
 0x29a   :  { %v810_v29 = vpack.c.b16 %v798_v25, %v798_v25  ;;  %v811_v26 = vpack.c.b16 %v799_v27, %v799_v27  ;;  %v709_v33 = vrot.slane %v706_v28, 4 }
 0x29b   :  { %v708_v31 = vpop.permute.xlu1 %707  ;;  %v265_v40 = vpop.permute.xlu2 %264 }
 0x29c   :  { %v710_v36 = vrot.slane %v708_v31, 4  ;;  %v830_v37 = vsel %vm90_vm5, %v810_v29, 0  ;;  %v833_v38 = vsel %vm90_vm5, %v811_v26, 0  ;;  %v268_v5 = vrot.slane %v265_v40, 4 }
 0x29d   :  { %866 = vmatpush.bf16.msrb.mxu2 %v830_v37  ;;  %879 = vmatpush.bf16.msrb.mxu3 %v833_v38  ;;  %vm271_vm5 = vcmask 1031168  }
 0x29e   :  { %v711_v46 = vsel %vm48_vm1, %v709_v33, %v710_v36 }
 0x29f   :  { %v713_v41 = vsel %vm712_vm14, %v706_v28, %v711_v46  ;;  %v968_v42 = vld [vmem:[#allocation3 + $0x2c] sm:$0xf0]  ;;  %v942_v47 = vld [vmem:[#allocation3 + $0x30] sm:$0xf0] }
 0x2a0   :  { %715 = vst [vmem:[#allocation3 + $0x38] sm:$0xcc] %v713_v41  ;;  %v941_v48 = vor.u32 %v968_v42, %v940_v39  ;;  %v945_v49 = vor.u32 %v966_v45, %v942_v47  ;;  %v899_v39 = vld [vmem:[%s1264_s0] sm:$0xff]  ;;  %v900_v41 = vld [vmem:[%s1264_s0 + $0x8] sm:$0xff] }
 0x2a1   :  { %v209_v50 = vpop.permute.xlu0 %208 }
 0x2a2   :  { %841 = vmatpush.bf16.msrb.mxu0 %v941_v48  ;;  %854 = vmatpush.bf16.msrb.mxu1 %v945_v49  ;;  %v212_v52 = vrot.slane %v209_v50, 4 }
 0x2a3   :  { %v211_v51 = vpop.permute.xlu1 %210  ;;  %v307_v0 = vpop.permute.xlu2 %306 }
 0x2a4   :  { %v213_v53 = vrot.slane %v211_v51, 4  ;;  %v309_v10 = vrot.slane %v307_v0, 4 }
 0x2a6   :  { %v215_v54 = vsel %vm48_vm1, %v212_v52, %v213_v53 }
 0x2a7   :  { %v217_v56 = vsel %vm216_vm15, %v209_v50, %v215_v54  ;;  %v969_v57 = vld [vmem:[#allocation3 + $0x34] sm:$0xf0]  ;;  %v950_v59 = vld [vmem:[#allocation3 + $0x38] sm:$0xf0] }
 0x2a8   :  { %219 = vst [vmem:[#allocation3] sm:$0xcc] %v217_v56  ;;  %v949_v60 = vor.u32 %v969_v57, %v948_v55  ;;  %v953_v61 = vor.u32 %v967_v58, %v950_v59 }
 0x2a9   :  { %v267_v1 = vpop.permute.xlu0 %266 }
 0x2aa   :  { %v269_v6 = vrot.slane %v267_v1, 4  ;;  %867 = vmatpush.bf16.msrb.mxu2 %v949_v60  ;;  %880 = vmatpush.bf16.msrb.mxu3 %v953_v61 }
 0x2ab   :  { %v305_v8 = vpop.permute.xlu1 %304 }
 0x2ac   :  { %v270_v4 = vsel %vm48_vm1, %v268_v5, %v269_v6  ;;  %v308_v43 = vrot.slane %v305_v8, 4 }
 0x2ad   :  { %v272_v32 = vsel %vm271_vm5, %v265_v40, %v270_v4 }
 0x2ae   :  { %274 = vst [vmem:[#allocation3 + $0x10] sm:$0x33] %v272_v32  ;;  %v310_v44 = vsel %vm48_vm1, %v308_v43, %v309_v10  ;;  %868 = vmatpush.bf16.msrb.mxu2 %v933_v9  ;;  %881 = vmatpush.bf16.msrb.mxu3 %v937_v3 }
 0x2af   :  { %v312_v30 = vsel %vm311_vm0, %v305_v8, %v310_v44  ;;  %v924_v12 = vld [vmem:[#allocation3] sm:$0xf]  ;;  %v962_v14 = vld [vmem:[#allocation3 + $0x4] sm:$0xf] }
 0x2b0   :  { %314 = vst [vmem:[#allocation3 + $0x10] sm:$0xcc] %v312_v30 }
 0x2b1   :  { %956 = vmatmul.msk.bf16.vlgmr.msrb.gmra.mxu2 %vm529_vm10, %v754_v11  ;;  %957 = vmatmul.msk.bf16.vlgmr.msrb.gmra.mxu3 %vm529_vm10, %v754_v11  ;;  %v768_v18 = vpop.permute.xlu0 %767 }
 0x2b7   :  { %v964_v13 = vld [vmem:[#allocation3 + $0xc] sm:$0xf0]  ;;  %v926_v15 = vld [vmem:[#allocation3 + $0x10] sm:$0xf0] }
 0x2b8   :  { %v925_v17 = vor.u32 %v964_v13, %v924_v12  ;;  %v929_v16 = vor.u32 %v962_v14, %v926_v15 }
 0x2ba   :  { %842 = vmatpush.bf16.msrb.mxu0 %v925_v17  ;;  %855 = vmatpush.bf16.msrb.mxu1 %v929_v16 }
 0x2bd   :  { %954 = vmatmul.msk.bf16.vlgmr.msrb.gmra.mxu0 %vm529_vm10, %v754_v11  ;;  %955 = vmatmul.msk.bf16.vlgmr.msrb.gmra.mxu1 %vm529_vm10, %v754_v11 }
 0x334   :  { %v870_v19 = vpop.f32.mrf.mxu2  ;;  %v883_v20 = vpop.f32.mrf.mxu3 }
 0x335   :  { %v871_v21 = vadd.f32 %v870_v19, %v768_v18  ;;  %v884_v34 = vadd.f32 %v883_v20, %v768_v18 }
 0x337   :  { %vm889_vm1 = vcmp.gt.f32.partialorder %v871_v21, 0.0  ;;  %v893_v23 = vmul.f32 0.1, %v871_v21  ;;  %vm890_vm2 = vcmp.gt.f32.partialorder %v884_v34, 0.0  ;;  %v894_v24 = vmul.f32 0.1, %v884_v34 }
 0x339   :  { %v897_v25 = vsel %vm889_vm1, %v871_v21, %v893_v23  ;;  %v898_v27 = vsel %vm890_vm2, %v884_v34, %v894_v24 }
 0x33a   :  { %v907_v28 = vadd.f32 %v958_v35, %v897_v25  ;;  %v908_v29 = vadd.f32 %v959_v22, %v898_v27  ;;  %v844_v26 = vpop.f32.mrf.mxu0  ;;  %v857_v31 = vpop.f32.mrf.mxu1 }
 0x33b   :  { %v845_v33 = vadd.f32 %v844_v26, %v768_v18  ;;  %v858_v36 = vadd.f32 %v857_v31, %v768_v18 }
 0x33c   :  { %960 = vst [vmem:[%s1270_s6 + $0x10] sm:$0xff] %v907_v28  ;;  %v872_v37 = vpop.f32.mrf.mxu2  ;;  %v885_v38 = vpop.f32.mrf.mxu3 }
 0x33d   :  { %961 = vst [vmem:[%s1270_s6 + $0x18] sm:$0xff] %v908_v29  ;;  %vm887_vm10 = vcmp.gt.f32.partialorder %v845_v33, 0.0  ;;  %v891_v46 = vmul.f32 0.1, %v845_v33  ;;  %vm888_vm3 = vcmp.gt.f32.partialorder %v858_v36, 0.0 }
 0x33e   :  { %v892_v40 = vmul.f32 0.1, %v858_v36 }
 0x33f   :  { %v895_v42 = vsel %vm887_vm10, %v845_v33, %v891_v46 }
 0x340   :  { %v901_v45 = vadd.f32 %v899_v39, %v895_v42  ;;  %v896_v47 = vsel %vm888_vm3, %v858_v36, %v892_v40 }
 0x341   :  { %v902_v48 = vadd.f32 %v900_v41, %v896_v47 }
 0x342   :  { %903 = vst [vmem:[%s1270_s6] sm:$0xff] %v901_v45  ;;  %v846_v49 = vpop.f32.mrf.mxu0  ;;  %v859_v50 = vpop.f32.mrf.mxu1 }
 0x343   :  { %904 = vst [vmem:[%s1270_s6 + $0x8] sm:$0xff] %v902_v48 }

</bundles_post_ra>
